<compile_context>
chip_gen: v5e
topology: v5e:2x2
jax: 0.10.0
libtpu: 0.0.40
codegen_flags: <defaults>
</compile_context>

<pallas_src>
import jax
import jax.numpy as jnp
from jax.experimental import pallas as pl
from jax.experimental.pallas import tpu as pltpu


# ---------------------------------------------------------------------------
# constant helper matrices (built in the wrapper, constant-folded under jit)
# ---------------------------------------------------------------------------
def _expansion_matrices(H, W, dtype=jnp.float32):
    """Eh[i, i*W+j] = 1 and Ew[j, i*W+j] = 1 (flat index k = i*W + j)."""
    k = jnp.arange(H * W)
    row = k // W                                                     # i of k
    col = k % W                                                      # j of k
    eh = (jnp.arange(H)[:, None] == row[None, :]).astype(dtype)      # (H, H*W)
    ew = (jnp.arange(W)[:, None] == col[None, :]).astype(dtype)      # (W, H*W)
    return eh, ew


def _vmem_limit(nbytes):
    """Explicit scoped-VMEM limit: need + headroom, clamped to [16, 64] MiB."""
    return int(min(64 * 2**20, max(16 * 2**20, int(1.5 * nbytes) + (2 << 20))))


def _pick_cout_tile(cout, cap=256):
    """Largest Cout tile <= cap that keeps the (8,128) block constraint."""
    if cout <= cap:
        return cout
    for t in range(cap, 0, -1):
        if cout % t == 0 and t % 8 == 0:
            return t
    return cout


# ---------------------------------------------------------------------------
# pass 1: coordinate pooling + emb conv (BN folded) + SiLU + attention heads
# ---------------------------------------------------------------------------
def _make_pool_attend_kernel(W):
    def kernel(x_ref, pool_ref, wemb_ref, bemb_ref, wh_ref, bh_ref,
               ww_ref, bw_ref, ah_ref, aw_ref):
        x = x_ref[...].astype(jnp.float32)                         # (C, H*W) lane-dense
        # Fused pooling: p[:, :W] = mean over height, p[:, W:] = mean over width.
        p = jnp.dot(x, pool_ref[...], preferred_element_type=jnp.float32)        # (C, W+H)
        # Shared 1x1 conv (eval-mode BN folded) + SiLU, fused over (W+H).
        e = jnp.dot(wemb_ref[...], p, preferred_element_type=jnp.float32) + bemb_ref[...]
        e = e * jax.nn.sigmoid(e)                                  # SiLU   (mip, W+H)
        e_w = e[:, :W]                                             # (mip, W)
        e_h = e[:, W:]                                             # (mip, H)
        aw_ref[...] = jax.nn.sigmoid(
            jnp.dot(ww_ref[...], e_w, preferred_element_type=jnp.float32) + bw_ref[...])
        ah_ref[...] = jax.nn.sigmoid(
            jnp.dot(wh_ref[...], e_h, preferred_element_type=jnp.float32) + bh_ref[...])
    return kernel


# ---------------------------------------------------------------------------
# pass 2: lane-dense outer-product writer  out[o, i*W+j] = a_h[o,i] * a_w[o,j]
# ---------------------------------------------------------------------------
def _outer_product_kernel(ah_ref, aw_ref, eh_ref, ew_ref, out_ref):
    h_exp = jnp.dot(ah_ref[...], eh_ref[...], preferred_element_type=jnp.float32)
    w_exp = jnp.dot(aw_ref[...], ew_ref[...], preferred_element_type=jnp.float32)
    out_ref[...] = (h_exp * w_exp).astype(out_ref.dtype)


# ---------------------------------------------------------------------------
# wrapper
# ---------------------------------------------------------------------------
def coordinate_attention_block(x, wemb_eff, bemb_eff, wh, bh, ww, bw):
    N, C, H, W = x.shape
    HW = H * W
    mip = wemb_eff.shape[0]
    cout = wh.shape[0]
    in_isz = jnp.dtype(x.dtype).itemsize
    out_dtype = x.dtype
    out_isz = jnp.dtype(out_dtype).itemsize

    # Lane-dense flat views (free reshapes outside the kernels).
    x_flat = x.reshape(N, C, HW)

    eh, ew = _expansion_matrices(H, W)
    # pool[k, :W] = 1/H where k%W == j   (mean over height -> p_w)
    # pool[k, W:] = 1/W where k//W == i  (mean over width  -> p_h)
    pool = jnp.concatenate([ew.T / H, eh.T / W], axis=1)              # (H*W, W+H)

    # ------------------------------ pass 1 --------------------------------
    p1_vmem = (2 * C * HW * in_isz
               + 2 * HW * (W + H) * 4
               + 2 * 4 * (mip * C + mip + 2 * cout * mip + 2 * cout)
               + 4 * cout * (W + H) * 4)
    p1_cost = pl.CostEstimate(
        flops=int(2 * N * (W + H) * (C * HW + mip * C + cout * mip)),
        transcendentals=int(2 * N * (mip + cout) * (W + H)),
        bytes_accessed=int(N * C * HW * in_isz + HW * (W + H) * 4
                           + N * cout * (W + H) * 4),
    )
    a_h, a_w = pl.pallas_call(
        _make_pool_attend_kernel(W),
        out_shape=(jax.ShapeDtypeStruct((N, cout, H), jnp.float32),
                   jax.ShapeDtypeStruct((N, cout, W), jnp.float32)),
        grid=(N,),
        in_specs=[
            pl.BlockSpec((None, C, HW), lambda n: (n, 0, 0)),   # x, lane-dense
            pl.BlockSpec((HW, W + H), lambda n: (0, 0)),        # pooling matrix
            pl.BlockSpec((mip, C), lambda n: (0, 0)),           # emb conv weight (BN folded)
            pl.BlockSpec((mip, 1), lambda n: (0, 0)),           # emb conv bias   (BN folded)
            pl.BlockSpec((cout, mip), lambda n: (0, 0)),        # att_h weight
            pl.BlockSpec((cout, 1), lambda n: (0, 0)),          # att_h bias
            pl.BlockSpec((cout, mip), lambda n: (0, 0)),        # att_w weight
            pl.BlockSpec((cout, 1), lambda n: (0, 0)),          # att_w bias
        ],
        out_specs=(pl.BlockSpec((None, cout, H), lambda n: (n, 0, 0)),
                   pl.BlockSpec((None, cout, W), lambda n: (n, 0, 0))),
        compiler_params=pltpu.CompilerParams(
            dimension_semantics=("parallel",),
            vmem_limit_bytes=_vmem_limit(p1_vmem)),
        cost_estimate=p1_cost,
    )(x_flat, pool, wemb_eff, bemb_eff, wh, bh, ww, bw)

    # ------------------------------ pass 2 --------------------------------
    c_tile = _pick_cout_tile(cout)
    p2_vmem = (4 * c_tile * (W + H) * 4
               + 2 * (W + H) * HW * 4
               + 2 * c_tile * HW * out_isz)
    p2_cost = pl.CostEstimate(
        flops=int(N * cout * HW * (2 * (W + H) + 1)),
        transcendentals=0,
        bytes_accessed=int(N * cout * (W + H) * 4 + (W + H) * HW * 4
                           + N * cout * HW * out_isz),
    )
    out_flat = pl.pallas_call(
        _outer_product_kernel,
        out_shape=jax.ShapeDtypeStruct((N, cout, HW), out_dtype),
        grid=(N, cout // c_tile),
        in_specs=[
            pl.BlockSpec((None, c_tile, H), lambda n, c: (n, c, 0)),   # a_h
            pl.BlockSpec((None, c_tile, W), lambda n, c: (n, c, 0)),   # a_w
            pl.BlockSpec((H, HW), lambda n, c: (0, 0)),                # Eh expander
            pl.BlockSpec((W, HW), lambda n, c: (0, 0)),                # Ew expander
        ],
        out_specs=pl.BlockSpec((None, c_tile, HW), lambda n, c: (n, c, 0)),
        compiler_params=pltpu.CompilerParams(
            dimension_semantics=("parallel", "parallel"),
            vmem_limit_bytes=_vmem_limit(p2_vmem)),
        cost_estimate=p2_cost,
    )(a_h, a_w, eh, ew)

    return out_flat.reshape(N, cout, H, W)


# ---------------------------------------------------------------------------
# parameters (synthetic) + pure-JAX reference
# ---------------------------------------------------------------------------
def init_params(key, in_channels, out_channels, reduction=32, eps=1e-5):
    """Deterministic synthetic parameters; folds eval-mode BatchNorm into the emb conv."""
    mip = max(4, in_channels // reduction)
    ks = jax.random.split(key, 10)
    wemb = 0.5 * jax.random.normal(ks[0], (mip, in_channels), jnp.float32)
    bemb = 0.1 * jax.random.normal(ks[1], (mip,), jnp.float32)
    gamma = 1.0 + 0.1 * jax.random.normal(ks[2], (mip,), jnp.float32)
    beta = 0.1 * jax.random.normal(ks[3], (mip,), jnp.float32)
    rmean = 0.1 * jax.random.normal(ks[4], (mip,), jnp.float32)
    rvar = 1.0 + 0.1 * jnp.abs(jax.random.normal(ks[5], (mip,), jnp.float32))
    wh = 0.5 * jax.random.normal(ks[6], (out_channels, mip), jnp.float32)
    bh = 0.1 * jax.random.normal(ks[7], (out_channels,), jnp.float32)
    ww = 0.5 * jax.random.normal(ks[8], (out_channels, mip), jnp.float32)
    bw = 0.1 * jax.random.normal(ks[9], (out_channels,), jnp.float32)

    # Fold eval-mode BatchNorm2d into the 1x1 emb conv.
    scale = gamma / jnp.sqrt(rvar + eps)                       # (mip,)
    wemb_eff = wemb * scale[:, None]                           # (mip, Cin)
    bemb_eff = (bemb - rmean) * scale + beta                   # (mip,)
    return (wemb_eff, bemb_eff.reshape(mip, 1),
            wh, bh.reshape(out_channels, 1),
            ww, bw.reshape(out_channels, 1))


def reference(x, wemb_eff, bemb_eff, wh, bh, ww, bw):
    """Pure-JAX reference mirroring the PyTorch forward (eval-mode BN folded)."""
    p_h = jnp.mean(x, axis=3)                                  # (N, C, H)
    p_w = jnp.mean(x, axis=2)                                  # (N, C, W)
    e_h = jax.nn.silu(jnp.einsum('mc,nch->nmh', wemb_eff, p_h) + bemb_eff[None])
    e_w = jax.nn.silu(jnp.einsum('mc,ncw->nmw', wemb_eff, p_w) + bemb_eff[None])
    a_h = jax.nn.sigmoid(jnp.einsum('om,nmh->noh', wh, e_h) + bh[None])
    a_w = jax.nn.sigmoid(jnp.einsum('om,nmw->now', ww, e_w) + bw[None])
    return a_h[:, :, :, None] * a_w[:, :, None, :]


if __name__ == "__main__":
    key = jax.random.PRNGKey(0)
    k_x, k_p = jax.random.split(key)

    N, Cin, Cout, H, W = 2, 4, 4, 16, 16
    x = jax.random.normal(k_x, (N, Cin, H, W), jnp.float32)
    params = init_params(k_p, Cin, Cout, reduction=32)

    fwd = jax.jit(coordinate_attention_block)
    out = jax.block_until_ready(fwd(x, *params))

    ref = reference(x, *params)
    assert out.shape == (N, Cout, H, W), out.shape
    if not jnp.allclose(out, ref, atol=2e-3, rtol=2e-3):
        err = float(jnp.max(jnp.abs(out - ref)))
        raise AssertionError(
            f"Pallas output does not match JAX reference (max abs err {err:.3e})")

    print("KERNEL_OK")
</pallas_src>

<mosaic_0001>
module attributes {stable_mosaic.version = 11 : i64} {
  func.func @kernel(%arg0: i32, %arg1: memref<1x4x256xf32, #tpu.memory_space<vmem>>, %arg2: memref<256x32xf32, #tpu.memory_space<vmem>>, %arg3: memref<4x4xf32, #tpu.memory_space<vmem>>, %arg4: memref<4x1xf32, #tpu.memory_space<vmem>>, %arg5: memref<4x4xf32, #tpu.memory_space<vmem>>, %arg6: memref<4x1xf32, #tpu.memory_space<vmem>>, %arg7: memref<4x4xf32, #tpu.memory_space<vmem>>, %arg8: memref<4x1xf32, #tpu.memory_space<vmem>>, %arg9: memref<1x4x16xf32, #tpu.memory_space<vmem>>, %arg10: memref<1x4x16xf32, #tpu.memory_space<vmem>>) attributes {dimension_semantics = [#tpu.dimension_semantics<parallel>], iteration_bounds = array<i64: 2>, scalar_prefetch = 0 : i64, scratch_operands = 0 : i64, tpu.core_type = #tpu.core_type<tc>, window_params = [{transform_indices = @transform_0, window_bounds = array<i64: 1, 4, 256>}, {pipeline_mode = #tpu.pipeline_mode<synchronous>, transform_indices = @transform_1, window_bounds = array<i64: 256, 32>}, {pipeline_mode = #tpu.pipeline_mode<synchronous>, transform_indices = @transform_2, window_bounds = array<i64: 4, 4>}, {pipeline_mode = #tpu.pipeline_mode<synchronous>, transform_indices = @transform_3, window_bounds = array<i64: 4, 1>}, {pipeline_mode = #tpu.pipeline_mode<synchronous>, transform_indices = @transform_4, window_bounds = array<i64: 4, 4>}, {pipeline_mode = #tpu.pipeline_mode<synchronous>, transform_indices = @transform_5, window_bounds = array<i64: 4, 1>}, {pipeline_mode = #tpu.pipeline_mode<synchronous>, transform_indices = @transform_6, window_bounds = array<i64: 4, 4>}, {pipeline_mode = #tpu.pipeline_mode<synchronous>, transform_indices = @transform_7, window_bounds = array<i64: 4, 1>}, {transform_indices = @transform_8, window_bounds = array<i64: 1, 4, 16>}, {transform_indices = @transform_9, window_bounds = array<i64: 1, 4, 16>}]} {
    %c0 = arith.constant 0 : index
    %c0_0 = arith.constant 0 : index
    %c0_1 = arith.constant 0 : index
    %0 = vector.load %arg1[%c0, %c0_0, %c0_1] : memref<1x4x256xf32, #tpu.memory_space<vmem>>, vector<1x4x256xf32>
    %1 = vector.shape_cast %0 : vector<1x4x256xf32> to vector<4x256xf32>
    %c0_2 = arith.constant 0 : index
    %c0_3 = arith.constant 0 : index
    %2 = vector.load %arg2[%c0_2, %c0_3] : memref<256x32xf32, #tpu.memory_space<vmem>>, vector<256x32xf32>
    %cst = arith.constant dense<0.000000e+00> : vector<4x32xf32>
    %3 = tpu.matmul %1, %2, %cst {dimension_numbers = #tpu.dot_dimension_numbers<[1], [0], [0], [1], [0, 0, 1, 1], [], []>} : vector<4x256xf32>, vector<256x32xf32>, vector<4x32xf32> -> vector<4x32xf32>
    %c0_4 = arith.constant 0 : index
    %c0_5 = arith.constant 0 : index
    %4 = vector.load %arg3[%c0_4, %c0_5] : memref<4x4xf32, #tpu.memory_space<vmem>>, vector<4x4xf32>
    %cst_6 = arith.constant dense<0.000000e+00> : vector<4x32xf32>
    %5 = tpu.matmul %4, %3, %cst_6 {dimension_numbers = #tpu.dot_dimension_numbers<[1], [0], [0], [1], [0, 0, 1, 1], [], []>} : vector<4x4xf32>, vector<4x32xf32>, vector<4x32xf32> -> vector<4x32xf32>
    %c0_7 = arith.constant 0 : index
    %c0_8 = arith.constant 0 : index
    %6 = vector.load %arg4[%c0_7, %c0_8] : memref<4x1xf32, #tpu.memory_space<vmem>>, vector<4x1xf32>
    %7 = vector.broadcast %6 : vector<4x1xf32> to vector<4x32xf32>
    %8 = arith.addf %5, %7 : vector<4x32xf32>
    %9 = arith.negf %8 : vector<4x32xf32>
    %10 = math.exp %9 : vector<4x32xf32>
    %cst_9 = arith.constant 1.000000e+00 : f32
    %11 = vector.broadcast %cst_9 : f32 to vector<4x32xf32>
    %12 = arith.addf %11, %10 : vector<4x32xf32>
    %13 = arith.divf %11, %12 : vector<4x32xf32>
    %14 = arith.mulf %8, %13 : vector<4x32xf32>
    %15 = vector.extract_strided_slice %14 {offsets = [0, 0], sizes = [4, 16], strides = [1, 1]} : vector<4x32xf32> to vector<4x16xf32>
    %16 = vector.extract_strided_slice %14 {offsets = [0, 16], sizes = [4, 16], strides = [1, 1]} : vector<4x32xf32> to vector<4x16xf32>
    %c0_10 = arith.constant 0 : index
    %c0_11 = arith.constant 0 : index
    %17 = vector.load %arg7[%c0_10, %c0_11] : memref<4x4xf32, #tpu.memory_space<vmem>>, vector<4x4xf32>
    %cst_12 = arith.constant dense<0.000000e+00> : vector<4x16xf32>
    %18 = tpu.matmul %17, %15, %cst_12 {dimension_numbers = #tpu.dot_dimension_numbers<[1], [0], [0], [1], [0, 0, 1, 1], [], []>} : vector<4x4xf32>, vector<4x16xf32>, vector<4x16xf32> -> vector<4x16xf32>
    %c0_13 = arith.constant 0 : index
    %c0_14 = arith.constant 0 : index
    %19 = vector.load %arg8[%c0_13, %c0_14] : memref<4x1xf32, #tpu.memory_space<vmem>>, vector<4x1xf32>
    %20 = vector.broadcast %19 : vector<4x1xf32> to vector<4x16xf32>
    %21 = arith.addf %18, %20 : vector<4x16xf32>
    %22 = arith.negf %21 : vector<4x16xf32>
    %23 = math.exp %22 : vector<4x16xf32>
    %cst_15 = arith.constant 1.000000e+00 : f32
    %24 = vector.broadcast %cst_15 : f32 to vector<4x16xf32>
    %25 = arith.addf %24, %23 : vector<4x16xf32>
    %26 = arith.divf %24, %25 : vector<4x16xf32>
    %c0_16 = arith.constant 0 : index
    %c0_17 = arith.constant 0 : index
    %c0_18 = arith.constant 0 : index
    %27 = vector.load %arg10[%c0_16, %c0_17, %c0_18] : memref<1x4x16xf32, #tpu.memory_space<vmem>>, vector<1x4x16xf32>
    %28 = vector.shape_cast %27 : vector<1x4x16xf32> to vector<4x16xf32>
    %29 = vector.shape_cast %26 : vector<4x16xf32> to vector<1x4x16xf32>
    tpu.vector_store %arg10[%c0_16, %c0_17, %c0_18], %29 {strides = array<i32>} : memref<1x4x16xf32, #tpu.memory_space<vmem>>, vector<1x4x16xf32>,
    %c0_19 = arith.constant 0 : index
    %c0_20 = arith.constant 0 : index
    %30 = vector.load %arg5[%c0_19, %c0_20] : memref<4x4xf32, #tpu.memory_space<vmem>>, vector<4x4xf32>
    %cst_21 = arith.constant dense<0.000000e+00> : vector<4x16xf32>
    %31 = tpu.matmul %30, %16, %cst_21 {dimension_numbers = #tpu.dot_dimension_numbers<[1], [0], [0], [1], [0, 0, 1, 1], [], []>} : vector<4x4xf32>, vector<4x16xf32>, vector<4x16xf32> -> vector<4x16xf32>
    %c0_22 = arith.constant 0 : index
    %c0_23 = arith.constant 0 : index
    %32 = vector.load %arg6[%c0_22, %c0_23] : memref<4x1xf32, #tpu.memory_space<vmem>>, vector<4x1xf32>
    %33 = vector.broadcast %32 : vector<4x1xf32> to vector<4x16xf32>
    %34 = arith.addf %31, %33 : vector<4x16xf32>
    %35 = arith.negf %34 : vector<4x16xf32>
    %36 = math.exp %35 : vector<4x16xf32>
    %cst_24 = arith.constant 1.000000e+00 : f32
    %37 = vector.broadcast %cst_24 : f32 to vector<4x16xf32>
    %38 = arith.addf %37, %36 : vector<4x16xf32>
    %39 = arith.divf %37, %38 : vector<4x16xf32>
    %c0_25 = arith.constant 0 : index
    %c0_26 = arith.constant 0 : index
    %c0_27 = arith.constant 0 : index
    %40 = vector.load %arg9[%c0_25, %c0_26, %c0_27] : memref<1x4x16xf32, #tpu.memory_space<vmem>>, vector<1x4x16xf32>
    %41 = vector.shape_cast %40 : vector<1x4x16xf32> to vector<4x16xf32>
    %42 = vector.shape_cast %39 : vector<4x16xf32> to vector<1x4x16xf32>
    tpu.vector_store %arg9[%c0_25, %c0_26, %c0_27], %42 {strides = array<i32>} : memref<1x4x16xf32, #tpu.memory_space<vmem>>, vector<1x4x16xf32>,
    return
  }
  func.func @transform_0(%arg0: i32) -> (i32, i32, i32) {
    %c0_i32 = arith.constant 0 : i32
    %c0_i32_0 = arith.constant 0 : i32
    %c0_i32_1 = arith.constant 0 : i32
    return %arg0, %c0_i32, %c0_i32_0 : i32, i32, i32
  }
  func.func @transform_1(%arg0: i32) -> (i32, i32) {
    %c0_i32 = arith.constant 0 : i32
    %c0_i32_0 = arith.constant 0 : i32
    %c0_i32_1 = arith.constant 0 : i32
    return %c0_i32, %c0_i32_0 : i32, i32
  }
  func.func @transform_2(%arg0: i32) -> (i32, i32) {
    %c0_i32 = arith.constant 0 : i32
    %c0_i32_0 = arith.constant 0 : i32
    %c0_i32_1 = arith.constant 0 : i32
    return %c0_i32, %c0_i32_0 : i32, i32
  }
  func.func @transform_3(%arg0: i32) -> (i32, i32) {
    %c0_i32 = arith.constant 0 : i32
    %c0_i32_0 = arith.constant 0 : i32
    %c0_i32_1 = arith.constant 0 : i32
    return %c0_i32, %c0_i32_0 : i32, i32
  }
  func.func @transform_4(%arg0: i32) -> (i32, i32) {
    %c0_i32 = arith.constant 0 : i32
    %c0_i32_0 = arith.constant 0 : i32
    %c0_i32_1 = arith.constant 0 : i32
    return %c0_i32, %c0_i32_0 : i32, i32
  }
  func.func @transform_5(%arg0: i32) -> (i32, i32) {
    %c0_i32 = arith.constant 0 : i32
    %c0_i32_0 = arith.constant 0 : i32
    %c0_i32_1 = arith.constant 0 : i32
    return %c0_i32, %c0_i32_0 : i32, i32
  }
  func.func @transform_6(%arg0: i32) -> (i32, i32) {
    %c0_i32 = arith.constant 0 : i32
    %c0_i32_0 = arith.constant 0 : i32
    %c0_i32_1 = arith.constant 0 : i32
    return %c0_i32, %c0_i32_0 : i32, i32
  }
  func.func @transform_7(%arg0: i32) -> (i32, i32) {
    %c0_i32 = arith.constant 0 : i32
    %c0_i32_0 = arith.constant 0 : i32
    %c0_i32_1 = arith.constant 0 : i32
    return %c0_i32, %c0_i32_0 : i32, i32
  }
  func.func @transform_8(%arg0: i32) -> (i32, i32, i32) {
    %c0_i32 = arith.constant 0 : i32
    %c0_i32_0 = arith.constant 0 : i32
    %c0_i32_1 = arith.constant 0 : i32
    return %arg0, %c0_i32, %c0_i32_0 : i32, i32, i32
  }
  func.func @transform_9(%arg0: i32) -> (i32, i32, i32) {
    %c0_i32 = arith.constant 0 : i32
    %c0_i32_0 = arith.constant 0 : i32
    %c0_i32_1 = arith.constant 0 : i32
    return %arg0, %c0_i32, %c0_i32_0 : i32, i32, i32
  }
}

module attributes {stable_mosaic.version = 11 : i64} {
  func.func @_outer_product_kernel(%arg0: i32, %arg1: i32, %arg2: memref<1x4x16xf32, #tpu.memory_space<vmem>>, %arg3: memref<1x4x16xf32, #tpu.memory_space<vmem>>, %arg4: memref<16x256xf32, #tpu.memory_space<vmem>>, %arg5: memref<16x256xf32, #tpu.memory_space<vmem>>, %arg6: memref<1x4x256xf32, #tpu.memory_space<vmem>>) attributes {dimension_semantics = [#tpu.dimension_semantics<parallel>, #tpu.dimension_semantics<parallel>], iteration_bounds = array<i64: 2, 1>, scalar_prefetch = 0 : i64, scratch_operands = 0 : i64, tpu.core_type = #tpu.core_type<tc>, window_params = [{transform_indices = @transform_0, window_bounds = array<i64: 1, 4, 16>}, {transform_indices = @transform_1, window_bounds = array<i64: 1, 4, 16>}, {pipeline_mode = #tpu.pipeline_mode<synchronous>, transform_indices = @transform_2, window_bounds = array<i64: 16, 256>}, {pipeline_mode = #tpu.pipeline_mode<synchronous>, transform_indices = @transform_3, window_bounds = array<i64: 16, 256>}, {transform_indices = @transform_4, window_bounds = array<i64: 1, 4, 256>}]} {
    %c0 = arith.constant 0 : index
    %c0_0 = arith.constant 0 : index
    %c0_1 = arith.constant 0 : index
    %0 = vector.load %arg2[%c0, %c0_0, %c0_1] : memref<1x4x16xf32, #tpu.memory_space<vmem>>, vector<1x4x16xf32>
    %1 = vector.shape_cast %0 : vector<1x4x16xf32> to vector<4x16xf32>
    %c0_2 = arith.constant 0 : index
    %c0_3 = arith.constant 0 : index
    %2 = vector.load %arg4[%c0_2, %c0_3] : memref<16x256xf32, #tpu.memory_space<vmem>>, vector<16x256xf32>
    %cst = arith.constant dense<0.000000e+00> : vector<4x256xf32>
    %3 = tpu.matmul %1, %2, %cst {dimension_numbers = #tpu.dot_dimension_numbers<[1], [0], [0], [1], [0, 0, 1, 1], [], []>} : vector<4x16xf32>, vector<16x256xf32>, vector<4x256xf32> -> vector<4x256xf32>
    %c0_4 = arith.constant 0 : index
    %c0_5 = arith.constant 0 : index
    %c0_6 = arith.constant 0 : index
    %4 = vector.load %arg3[%c0_4, %c0_5, %c0_6] : memref<1x4x16xf32, #tpu.memory_space<vmem>>, vector<1x4x16xf32>
    %5 = vector.shape_cast %4 : vector<1x4x16xf32> to vector<4x16xf32>
    %c0_7 = arith.constant 0 : index
    %c0_8 = arith.constant 0 : index
    %6 = vector.load %arg5[%c0_7, %c0_8] : memref<16x256xf32, #tpu.memory_space<vmem>>, vector<16x256xf32>
    %cst_9 = arith.constant dense<0.000000e+00> : vector<4x256xf32>
    %7 = tpu.matmul %5, %6, %cst_9 {dimension_numbers = #tpu.dot_dimension_numbers<[1], [0], [0], [1], [0, 0, 1, 1], [], []>} : vector<4x16xf32>, vector<16x256xf32>, vector<4x256xf32> -> vector<4x256xf32>
    %8 = arith.mulf %3, %7 : vector<4x256xf32>
    %c0_10 = arith.constant 0 : index
    %c0_11 = arith.constant 0 : index
    %c0_12 = arith.constant 0 : index
    %9 = vector.load %arg6[%c0_10, %c0_11, %c0_12] : memref<1x4x256xf32, #tpu.memory_space<vmem>>, vector<1x4x256xf32>
    %10 = vector.shape_cast %9 : vector<1x4x256xf32> to vector<4x256xf32>
    %11 = vector.shape_cast %8 : vector<4x256xf32> to vector<1x4x256xf32>
    tpu.vector_store %arg6[%c0_10, %c0_11, %c0_12], %11 {strides = array<i32>} : memref<1x4x256xf32, #tpu.memory_space<vmem>>, vector<1x4x256xf32>,
    return
  }
  func.func @transform_0(%arg0: i32, %arg1: i32) -> (i32, i32, i32) {
    %c0_i32 = arith.constant 0 : i32
    %c0_i32_0 = arith.constant 0 : i32
    return %arg0, %arg1, %c0_i32 : i32, i32, i32
  }
  func.func @transform_1(%arg0: i32, %arg1: i32) -> (i32, i32, i32) {
    %c0_i32 = arith.constant 0 : i32
    %c0_i32_0 = arith.constant 0 : i32
    return %arg0, %arg1, %c0_i32 : i32, i32, i32
  }
  func.func @transform_2(%arg0: i32, %arg1: i32) -> (i32, i32) {
    %c0_i32 = arith.constant 0 : i32
    %c0_i32_0 = arith.constant 0 : i32
    %c0_i32_1 = arith.constant 0 : i32
    return %c0_i32, %c0_i32_0 : i32, i32
  }
  func.func @transform_3(%arg0: i32, %arg1: i32) -> (i32, i32) {
    %c0_i32 = arith.constant 0 : i32
    %c0_i32_0 = arith.constant 0 : i32
    %c0_i32_1 = arith.constant 0 : i32
    return %c0_i32, %c0_i32_0 : i32, i32
  }
  func.func @transform_4(%arg0: i32, %arg1: i32) -> (i32, i32, i32) {
    %c0_i32 = arith.constant 0 : i32
    %c0_i32_0 = arith.constant 0 : i32
    return %arg0, %arg1, %c0_i32 : i32, i32, i32
  }
}

</mosaic_0001>

<bundles_post_ra>
// kernel: coordinate_attention_block.3
= control target key start
LH: loop header
LB: loop body
LE: loop exit
PB: predicated region body
PF: predicated region fallthrough
CT: control target
= control target key end

     0   :  { %s552_s15 = smov 0   ;;  %s554_s16 = smov 0   ;;  %s616_s0 = inlined_call_operand.vmem [shape: f32[2,4,16], index: 0, kind: input, shape index: {}]   ;;  %s617_s1 = inlined_call_operand.vmem [shape: f32[2,4,16], index: 1, kind: input, shape index: {}]   ;;  %s618_s2 = inlined_call_operand.vmem [shape: f32[16,256], index: 2, kind: input, shape index: {}]   ;;  %s619_s3 = inlined_call_operand.vmem [shape: f32[16,256], index: 3, kind: input, shape index: {}]   ;;  %s620_s4 = inlined_call_operand.vmem [shape: f32[2,4,256], index: 4, kind: output, shape index: {}]  }
   0x1   :  { %s556_s17 = smov 0  }
   0x2 LB: > { %s26_s18 = sadd.s32 1, %s521_s16  ;;  %p467_p0 = scmp.ge.s32.totalorder %s525_s17, 1  ;;  %s525_s17 = sphi %s556_s17, %s14_s17   ;;  %s521_s16 = sphi %s554_s16, %s622_s16   ;;  %s517_s15 = sphi %s552_s15, %s621_s15  }
   0x3   : > { %p28_p1 = scmp.ge.s32.totalorder %s26_s18, 2  ;;  %p194_p2 = scmp.lt.s32.totalorder %s525_s17, 3 }
   0x5   : > { %s624_s18 = smov (%p28_p1, %s26_s18), 0  ;;  %p195_p3 = pnand %p467_p0, %p194_p2 }
   0x6   : > { %p233_p4 = scmp.lt.s32.totalorder (!%p195_p3), %s517_s15, 1 }
   0x7   : > { %198 = sbr.rel (%p195_p3) target bundleno = 155 (0x9b), region = 36 }
   0xc   : > { %v309_v0 = vld [vmem:[%s619_s3 + $0x18] sm:$0xff]  ;;  %v308_v1 = vld [vmem:[%s619_s3 + $0x10] sm:$0xff]  ;;  %v307_v2 = vld [vmem:[%s619_s3 + $0x8] sm:$0xff]  ;;  %s626_s15 = smov (!%p233_p4, %s517_s15), 1  ;;  %vm261_vm0 = vcmask 130048   ;;  %vm358_vm1 = vcmask 1043456  }
   0xd   : > { %347 = vmatpush.msra.mxu3 %v309_v0  ;;  %327 = vmatpush.msra.mxu2 %v308_v1  ;;  %v306_v3 = vld [vmem:[%s619_s3] sm:$0xff]  ;;  %v260_v4 = vld [vmem:[%s618_s2 + $0x18] sm:$0xff]  ;;  %v259_v5 = vld [vmem:[%s618_s2 + $0x10] sm:$0xff]  ;;  %s468_s9 = sshll.u32 %s626_s15, 2  ;;  %s478_s20 = sshll.u32 %s626_s15, 3 }
   0xe   : > { %299 = vmatpush.msra.mxu1 %v260_v4  ;;  %279 = vmatpush.msra.mxu0 %v259_v5  ;;  %v258_v6 = vld [vmem:[%s618_s2 + $0x8] sm:$0xff]  ;;  %v257_v7 = vld [vmem:[%s618_s2] sm:$0xff]  ;;  %s246_s12 = scalar_lea.vmem %s617_s1, %s468_s9  ;;  %s239_s19 = scalar_lea.vmem %s616_s0, %s468_s9 }
   0xf   : > { %348 = vmatpush.msra.mxu3 %v307_v2  ;;  %328 = vmatpush.msra.mxu2 %v306_v3  ;;  %v305_v8 = vld [vmem:[%s246_s12] sm:$0xf]  ;;  %s255_s23 = scalar_lea.vmem %s620_s4, %s478_s20 }
  0x10   : > { %300 = vmatpush.msra.mxu1 %v258_v6  ;;  %280 = vmatpush.msra.mxu0 %v257_v7  ;;  %v256_v9 = vld [vmem:[%s239_s19] sm:$0xf] }
  0x11   : > { %475 = vmatmul.msk.f32.vlgmr.msra.gmra.mxu3 %vm261_vm0, %v305_v8  ;;  %474 = vmatmul.msk.f32.vlgmr.msra.gmra.mxu2 %vm261_vm0, %v305_v8 }
  0x12   : > { %473 = vmatmul.msk.f32.vlgmr.msra.gmra.mxu1 %vm261_vm0, %v256_v9  ;;  %472 = vmatmul.msk.f32.vlgmr.msra.gmra.mxu0 %vm261_vm0, %v256_v9 }
  0x8f   : > { %v302_v10 = vpop.f32.mrf.mxu1  ;;  %v282_v11 = vpop.f32.mrf.mxu0 }
  0x94   : > { %v350_v12 = vpop.f32.mrf.mxu3  ;;  %v330_v13 = vpop.f32.mrf.mxu2 }
  0x95   : > { %v354_v14 = vmul.f32 %v350_v12, %v302_v10  ;;  %v353_v15 = vmul.f32 %v330_v13, %v282_v11 }
  0x97   : > { %v357_v16 = vrot.slane %v354_v14, 4 }
  0x99   : > { %v359_v17 = vsel %vm358_vm1, %v353_v15, %v357_v16 }
  0x9a   : > { %361 = vst [vmem:[%s255_s23] sm:$0xff] %v359_v17 }
  0x9b PF: > { %s14_s17 = sadd.s32 1, %s525_s17   ;;  %s621_s15 = smov %s521_s16 }
  0x9c   : > { %p11_p5 = scmp.ge.s32.totalorder %s14_s17, 4   ;;  %s622_s16 = smov %s624_s18 }
  0x9e   :  { %13 = sbr.rel (!%p11_p5) target bundleno = 2 (0x2), region = 69 }

// kernel: coordinate_attention_block.2
= control target key start
LH: loop header
LB: loop body
LE: loop exit
PB: predicated region body
PF: predicated region fallthrough
CT: control target
= control target key end

     0   :  { %s773_s30 = smov 0   ;;  %s919_s0 = inlined_call_operand.vmem [shape: f32[2,4,256], index: 0, kind: input, shape index: {}]   ;;  %s920_s1 = inlined_call_operand.vmem [shape: f32[256,32], index: 1, kind: input, shape index: {}]   ;;  %s921_s2 = inlined_call_operand.vmem [shape: f32[4,4], index: 2, kind: input, shape index: {}]   ;;  %s922_s3 = inlined_call_operand.vmem [shape: f32[4,1], index: 3, kind: input, shape index: {}]   ;;  %s923_s4 = inlined_call_operand.vmem [shape: f32[4,4], index: 4, kind: input, shape index: {}]   ;;  %s924_s5 = inlined_call_operand.vmem [shape: f32[4,1], index: 5, kind: input, shape index: {}]   ;;  %s925_s6 = inlined_call_operand.vmem [shape: f32[4,4], index: 6, kind: input, shape index: {}]   ;;  %s926_s7 = inlined_call_operand.vmem [shape: f32[4,1], index: 7, kind: input, shape index: {}]   ;;  %s927_s8 = inlined_call_operand.vmem [shape: f32[2,4,16], index: 8, kind: output, shape index: {0}]   ;;  %s928_s9 = inlined_call_operand.vmem [shape: f32[2,4,16], index: 9, kind: output, shape index: {1}]  }
   0x1 LB: > { %s668_s10 = sadd.s32 4294967295, %s719_s30   ;;  %p672_p0 = scmp.ge.s32.totalorder %s719_s30, 1  ;;  %s719_s30 = sphi %s773_s30, %s20_s30  }
   0x2   : > { %p290_p1 = scmp.lt.s32.totalorder %s719_s30, 3 }
   0x4   : > { %p291_p2 = pnand %p672_p0, %p290_p1 }
   0x5   : > { %p329_p3 = scmp.lt.s32.totalorder (!%p291_p2), %s668_s10, 1  ;;  %s722_s28 = smov (!%p291_p2), 112  }
   0x6   : > { %294 = sbr.rel (%p291_p2) target bundleno = 616 (0x268), region = 52 }
   0xb   : > { %v358_v0 = vld [vmem:[%s920_s1 + $0x78] sm:$0xff]  ;;  %v357_v2 = vld [vmem:[%s920_s1 + $0x70] sm:$0xff]  ;;  %v356_v4 = vld [vmem:[%s920_s1 + $0x68] sm:$0xff]  ;;  %s930_s10 = smov (!%p329_p3, %s668_s10), 1  ;;  %v721_v36 = vmov 0   ;;  %vm432_vm0 = vcmask 1043456  }
   0xc   : > { %v374_v1 = vld [vmem:[%s920_s1 + $0xf8] sm:$0xff]  ;;  %381 = vmatpush.msra.mxu0 %v358_v0  ;;  %v373_v3 = vld [vmem:[%s920_s1 + $0xf0] sm:$0xff]  ;;  %v372_v5 = vld [vmem:[%s920_s1 + $0xe8] sm:$0xff]  ;;  %s688_s27 = sshll.u32 %s930_s10, 3  ;;  %699 = vset.pattern.permute.xlu0 %v721_v36  ;;  %vm428_vm1 = vcmask 31744   ;;  %s675_s16 = sshll.u32 %s930_s10, 2 }
   0xd   : > { %401 = vmatpush.msra.mxu1 %v374_v1  ;;  %v355_v6 = vld [vmem:[%s920_s1 + $0x60] sm:$0xff]  ;;  %v354_v8 = vld [vmem:[%s920_s1 + $0x58] sm:$0xff]  ;;  %s333_s15 = scalar_lea.vmem %s919_s0, %s688_s27  ;;  %v353_v10 = vld [vmem:[%s920_s1 + $0x50] sm:$0xff]  ;;  %700 = vset.pattern.permute.xlu1 %v721_v36  ;;  %s341_s19 = scalar_lea.vmem %s928_s9, %s675_s16  ;;  %vm528_vm10 = vcmask 125952  }
   0xe   : > { %382 = vmatpush.msra.mxu0 %v357_v2  ;;  %v371_v7 = vld [vmem:[%s920_s1 + $0xe0] sm:$0xff]  ;;  %v370_v9 = vld [vmem:[%s920_s1 + $0xd8] sm:$0xff]  ;;  %v369_v11 = vld [vmem:[%s920_s1 + $0xd0] sm:$0xff]  ;;  %s337_s21 = scalar_lea.vmem %s927_s8, %s675_s16 }
   0xf   : > { %402 = vmatpush.msra.mxu1 %v373_v3  ;;  %v352_v12 = vld [vmem:[%s920_s1 + $0x48] sm:$0xff]  ;;  %v342_v14 = vld [vmem:[%s333_s15] sm:$0xff]  ;;  %v350_v17 = vld [vmem:[%s920_s1 + $0x38] sm:$0xff] }
  0x10   : > { %383 = vmatpush.msra.mxu0 %v356_v4  ;;  %v368_v13 = vld [vmem:[%s920_s1 + $0xc8] sm:$0xff]  ;;  %376 = vst [vmem:[#allocation1] ss:$2 sm:$0xff] %v342_v14  ;;  %v351_v15 = vld [vmem:[%s920_s1 + $0x40] sm:$0xff]  ;;  %v366_v18 = vld [vmem:[%s920_s1 + $0xb8] sm:$0xff] }
  0x11   : > { %403 = vmatpush.msra.mxu1 %v372_v5  ;;  %v367_v16 = vld [vmem:[%s920_s1 + $0xc0] sm:$0xff]  ;;  %v349_v19 = vld [vmem:[%s920_s1 + $0x30] sm:$0xff]  ;;  %v348_v21 = vld [vmem:[%s920_s1 + $0x28] sm:$0xff] }
  0x12   : > { %384 = vmatpush.msra.mxu0 %v355_v6  ;;  %v365_v20 = vld [vmem:[%s920_s1 + $0xb0] sm:$0xff]  ;;  %v364_v22 = vld [vmem:[%s920_s1 + $0xa8] sm:$0xff]  ;;  %v347_v23 = vld [vmem:[%s920_s1 + $0x20] sm:$0xff] }
  0x13   : > { %404 = vmatpush.msra.mxu1 %v371_v7  ;;  %v363_v24 = vld [vmem:[%s920_s1 + $0xa0] sm:$0xff]  ;;  %v346_v25 = vld [vmem:[%s920_s1 + $0x18] sm:$0xff]  ;;  %v345_v27 = vld [vmem:[%s920_s1 + $0x10] sm:$0xff] }
  0x14   : > { %385 = vmatpush.msra.mxu0 %v354_v8  ;;  %v362_v26 = vld [vmem:[%s920_s1 + $0x98] sm:$0xff]  ;;  %v361_v28 = vld [vmem:[%s920_s1 + $0x90] sm:$0xff]  ;;  %v344_v29 = vld [vmem:[%s920_s1 + $0x8] sm:$0xff] }
  0x15   : > { %405 = vmatpush.msra.mxu1 %v370_v9  ;;  %v360_v30 = vld [vmem:[%s920_s1 + $0x88] sm:$0xff]  ;;  %v343_v31 = vld [vmem:[%s920_s1] sm:$0xff] }
  0x16   : > { %386 = vmatpush.msra.mxu0 %v353_v10  ;;  %v359_v32 = vld [vmem:[%s920_s1 + $0x80] sm:$0xff] }
  0x17   : > { %406 = vmatpush.msra.mxu1 %v369_v11  ;;  %v377_v33 = vld.sshfl [vmem:[#allocation1] sm:$0xff pattern:$0x75316420]  ;;  %v378_v34 = vld.sshfl [vmem:[#allocation1 + $0x8] sm:$0xff pattern:$0x75316420] }
  0x18   : > { %387 = vmatpush.msra.mxu0 %v352_v12  ;;  %v422_v35 = vld [vmem:[%s922_s3] sm:$0xf] }
  0x19   : > { %407 = vmatpush.msra.mxu1 %v368_v13  ;;  %425 = vperm.xlu0 %699, %v422_v35   ;;  %v421_v40 = vld [vmem:[%s921_s2] sm:$0xf] }
  0x1a   : > { %388 = vmatpush.msra.mxu0 %v351_v15  ;;  %v476_v58 = vld [vmem:[%s925_s6] sm:$0xf] }
  0x1b   : > { %408 = vmatpush.msra.mxu1 %v367_v16  ;;  %v477_v59 = vld [vmem:[%s926_s7] sm:$0xf] }
  0x1c   : > { %389 = vmatpush.msra.mxu0 %v350_v17  ;;  %480 = vperm.xlu1 %700, %v477_v59   ;;  %v531_v60 = vld [vmem:[%s924_s5] sm:$0xf] }
  0x1d   : > { %409 = vmatpush.msra.mxu1 %v366_v18  ;;  %v530_v61 = vld [vmem:[%s923_s4] sm:$0xf] }
  0x1e   : > { %390 = vmatpush.msra.mxu0 %v349_v19 }
  0x1f   : > { %410 = vmatpush.msra.mxu1 %v365_v20 }
  0x20   : > { %391 = vmatpush.msra.mxu0 %v348_v21 }
  0x21   : > { %411 = vmatpush.msra.mxu1 %v364_v22 }
  0x22   : > { %392 = vmatpush.msra.mxu0 %v347_v23 }
  0x23   : > { %412 = vmatpush.msra.mxu1 %v363_v24 }
  0x24   : > { %393 = vmatpush.msra.mxu0 %v346_v25  ;;  %534 = vperm.xlu1 %700, %v531_v60  }
  0x25   : > { %413 = vmatpush.msra.mxu1 %v362_v26 }
  0x26   : > { %394 = vmatpush.msra.mxu0 %v345_v27 }
  0x27   : > { %414 = vmatpush.msra.mxu1 %v361_v28 }
  0x28   : > { %395 = vmatpush.msra.mxu0 %v344_v29 }
  0x29   : > { %415 = vmatpush.msra.mxu1 %v360_v30 }
  0x2a   : > { %396 = vmatpush.msra.mxu0 %v343_v31 }
  0x2b   : > { %416 = vmatpush.msra.mxu1 %v359_v32  ;;  %397 = vmatmul.f32.vlgmr.msra.gmra.mxu0 %v377_v33 }
  0x2c   : > { %417 = vmatmul.f32.vlgmr.msra.gmra.mxu1 %v378_v34 }
  0x8b   : > { %v426_v41 = vpop.permute.xlu0 %425 }
  0x8e   : > { %v481_v0 = vpop.permute.xlu1 %480 }
  0x96   : > { %v535_v15 = vpop.permute.xlu1 %534 }
  0xa8   : > { %v398_v37 = vpop.f32.mrf.mxu0 }
  0xa9   : > { %v418_v38 = vpop.f32.mrf.mxu1 }
  0xaa   : > { %v419_v39 = vadd.f32 %v418_v38, %v398_v37 }
  0xac   : > { %677 = vmatpush.msk.msra.mxu2 %vm432_vm0, %v419_v39 }
  0xad   : > { %678 = vmatmul.msk.f32.vlgmr.msra.gmra.mxu2 %vm428_vm1, %v421_v40 }
 0x130   : > { %v453_v42 = vpop.f32.mrf.mxu2 }
 0x131   : > { %v454_v43 = vadd.f32 %v453_v42, %v426_v41 }
 0x133   : > { %v679_v44 = vmul.f32 -1.442695, %v454_v43 }
 0x135   : > { %701 = vpow2.f32 %v679_v44 }
 0x13b   : > { %v702_v45 = vpop.eup %701 }
 0x13c   : > { %v459_v46 = vadd.f32 1.0, %v702_v45 }
 0x13e   : > { %703 = vrcp.f32 %v459_v46  ;;  %v471_v50 = vand.u32 2147483648, %v459_v46  ;;  %v469_v52 = vand.u32 2147483647, %v459_v46  ;;  %vm465_vm3 = vweird.f32 %v459_v46 }
 0x140   : > { %v472_v54 = vor.u32 1.1754944e-38, %v471_v50  ;;  %vm470_vm5 = vcmp.eq.f32.partialorder %v469_v52, 8.507059e+37 }
 0x144   : > { %v704_v47 = vpop.eup %703 }
 0x145   : > { %v461_v48 = vmul.f32 %v704_v47, %v459_v46  ;;  %vm466_vm2 = vweird.f32 %v704_v47 }
 0x146   : > { %vm467_vm4 = vmor %vm465_vm3, %vm466_vm2 }
 0x147   : > { %v462_v49 = vsub.f32 1.0, %v461_v48 }
 0x149   : > { %v463_v51 = vmul.f32 %v704_v47, %v462_v49 }
 0x14b   : > { %v464_v53 = vadd.f32 %v704_v47, %v463_v51 }
 0x14d   : > { %v468_v55 = vsel %vm467_vm4, %v704_v47, %v464_v53 }
 0x14e   : > { %v473_v56 = vsel %vm470_vm5, %v472_v54, %v468_v55 }
 0x14f   : > { %v475_v57 = vmul.f32 %v473_v56, %v454_v43 }
 0x151   : > { %537 = vrot.lane.b32.xlu0 %v475_v57, %s722_s28  ;;  %680 = vmatpush.msk.msra.mxu3 %vm432_vm0, %v475_v57 }
 0x152   : > { %681 = vmatmul.msk.f32.vlgmr.msra.gmra.mxu3 %vm428_vm1, %v476_v58 }
 0x1c3   : > { %v538_v62 = vpop.permute.xlu0 %537 }
 0x1c4   : > { %683 = vmatpush.msk.msrb.mxu2 %vm432_vm0, %v538_v62 }
 0x1c5   : > { %684 = vmatmul.msk.f32.vlgmr.msrb.gmra.mxu2 %vm428_vm1, %v530_v61 }
 0x1d5   : > { %v506_v63 = vpop.f32.mrf.mxu3 }
 0x1d6   : > { %v507_v1 = vadd.f32 %v506_v63, %v481_v0 }
 0x1d8   : > { %v682_v2 = vmul.f32 -1.442695, %v507_v1 }
 0x1da   : > { %705 = vpow2.f32 %v682_v2 }
 0x1e0   : > { %v706_v3 = vpop.eup %705 }
 0x1e1   : > { %v512_v4 = vadd.f32 1.0, %v706_v3 }
 0x1e3   : > { %707 = vrcp.f32 %v512_v4  ;;  %v524_v7 = vand.u32 2147483648, %v512_v4  ;;  %vm518_vm6 = vweird.f32 %v512_v4  ;;  %v522_v9 = vand.u32 2147483647, %v512_v4 }
 0x1e5   : > { %v525_v11 = vor.u32 1.1754944e-38, %v524_v7  ;;  %vm523_vm9 = vcmp.eq.f32.partialorder %v522_v9, 8.507059e+37 }
 0x1e9   : > { %v708_v5 = vpop.eup %707 }
 0x1ea   : > { %v514_v6 = vmul.f32 %v708_v5, %v512_v4  ;;  %vm519_vm7 = vweird.f32 %v708_v5 }
 0x1eb   : > { %vm520_vm8 = vmor %vm518_vm6, %vm519_vm7 }
 0x1ec   : > { %v515_v8 = vsub.f32 1.0, %v514_v6 }
 0x1ee   : > { %v516_v10 = vmul.f32 %v708_v5, %v515_v8 }
 0x1f0   : > { %v517_v12 = vadd.f32 %v708_v5, %v516_v10 }
 0x1f2   : > { %v521_v13 = vsel %vm520_vm8, %v708_v5, %v517_v12 }
 0x1f3   : > { %v526_v14 = vsel %vm523_vm9, %v525_v11, %v521_v13 }
 0x1f4   : > { %529 = vst.msk [vmem:[%s341_s19] sm:$0xf] %vm528_vm10, %v526_v14 }
 0x248   : > { %v561_v16 = vpop.f32.mrf.mxu2 }
 0x249   : > { %v562_v17 = vadd.f32 %v561_v16, %v535_v15 }
 0x24b   : > { %v685_v18 = vmul.f32 -1.442695, %v562_v17 }
 0x24d   : > { %709 = vpow2.f32 %v685_v18 }
 0x253   : > { %v710_v19 = vpop.eup %709 }
 0x254   : > { %v567_v20 = vadd.f32 1.0, %v710_v19 }
 0x256   : > { %711 = vrcp.f32 %v567_v20  ;;  %v579_v24 = vand.u32 2147483648, %v567_v20  ;;  %v577_v26 = vand.u32 2147483647, %v567_v20  ;;  %vm573_vm12 = vweird.f32 %v567_v20 }
 0x258   : > { %v580_v28 = vor.u32 1.1754944e-38, %v579_v24  ;;  %vm578_vm14 = vcmp.eq.f32.partialorder %v577_v26, 8.507059e+37 }
 0x25c   : > { %v712_v21 = vpop.eup %711 }
 0x25d   : > { %v569_v22 = vmul.f32 %v712_v21, %v567_v20  ;;  %vm574_vm11 = vweird.f32 %v712_v21 }
 0x25e   : > { %vm575_vm13 = vmor %vm573_vm12, %vm574_vm11 }
 0x25f   : > { %v570_v23 = vsub.f32 1.0, %v569_v22 }
 0x261   : > { %v571_v25 = vmul.f32 %v712_v21, %v570_v23 }
 0x263   : > { %v572_v27 = vadd.f32 %v712_v21, %v571_v25 }
 0x265   : > { %v576_v29 = vsel %vm575_vm13, %v712_v21, %v572_v27 }
 0x266   : > { %v581_v30 = vsel %vm578_vm14, %v580_v28, %v576_v29 }
 0x267   : > { %583 = vst.msk [vmem:[%s337_s21] sm:$0xf] %vm528_vm10, %v581_v30 }
 0x268 PF: > { %s20_s30 = sadd.s32 1, %s719_s30  }
 0x269   : > { %p17_p4 = scmp.ge.s32.totalorder %s20_s30, 4  }
 0x26b   :  { %19 = sbr.rel (!%p17_p4) target bundleno = 1 (0x1), region = 94 }

</bundles_post_ra>
